<compile_context>
chip_gen: v7x
topology: tpu7x:2x2x1
jax: 0.10.0
libtpu: 0.0.40
codegen_flags: <defaults>
</compile_context>

<pallas_src>
import functools

import jax
import jax.numpy as jnp
from jax.experimental import pallas as pl
from jax.experimental.pallas import tpu as pltpu


# ---------------------------------------------------------------------------
# Kernel
# ---------------------------------------------------------------------------
def _lora_kernel(x_ref, wd_ref, wu_ref, o_ref, *, scale):
    # x_ref:  (TM, in)      in the caller's dtype
    # wd_ref: (in, r_pad)   weight dtype (resident across grid steps)
    # wu_ref: (r_pad, out)  weight dtype (resident across grid steps)
    # o_ref:  (TM, out)     caller's dtype
    x = x_ref[...].astype(wd_ref.dtype)                 # hidden_states.to(weight dtype)
    h = jnp.dot(x, wd_ref[...], preferred_element_type=jnp.float32)
    if scale != 1.0:
        # alpha/rank on the narrow (TM, r_pad) intermediate instead of the wide
        # (TM, out) output: ~out/r_pad fewer VPU multiplies per row, same math.
        h = h * scale
    h = h.astype(wu_ref.dtype)                          # down output in weight dtype
    y = jnp.dot(h, wu_ref[...], preferred_element_type=jnp.float32)
    o_ref[...] = y.astype(o_ref.dtype)                  # cast back to input dtype


# ---------------------------------------------------------------------------
# Wrapper
# ---------------------------------------------------------------------------
_SUBLANE_BY_ITEMSIZE = {4: 8, 2: 16, 1: 32}


def _round_up(x, m):
    return ((x + m - 1) // m) * m


def _vmem_capacity_bytes():
    try:
        cap = getattr(pltpu.get_tpu_info(), "vmem_capacity_bytes", None)
        if cap:
            return int(cap)
    except Exception:
        pass
    return 64 << 20  # conservative floor (v7x per-TensorCore VMEM)


def _build_call(*, M, TM, in_features, r_pad, out_features, out_dtype,
                scale, vmem_limit, cost, single_buffer_weights):
    wkw = {"pipeline_mode": pl.Buffered(1)} if single_buffer_weights else {}
    return pl.pallas_call(
        functools.partial(_lora_kernel, scale=scale),
        out_shape=jax.ShapeDtypeStruct((M, out_features), out_dtype),
        grid=(pl.cdiv(M, TM),),
        in_specs=[
            pl.BlockSpec((TM, in_features), lambda i: (i, 0)),
            # Constant index_map: weight blocks are DMA'd once and stay resident.
            pl.BlockSpec((in_features, r_pad), lambda i: (0, 0), **wkw),
            pl.BlockSpec((r_pad, out_features), lambda i: (0, 0), **wkw),
        ],
        out_specs=pl.BlockSpec((TM, out_features), lambda i: (i, 0)),
        compiler_params=pltpu.CompilerParams(
            dimension_semantics=("parallel",),
            vmem_limit_bytes=vmem_limit,
        ),
        cost_estimate=cost,
    )


def lora_linear_forward(x, w_down, w_up, *, network_alpha=None, block_rows=None):
    """LoRA forward matching the PyTorch module's dtype path.

    x:      (..., in_features), any float dtype (output keeps this dtype)
    w_down: (in_features, rank)   [= torch down.weight.T]
    w_up:   (rank, out_features)  [= torch up.weight.T]
    """
    orig_dtype = x.dtype
    *lead, in_features = x.shape
    rank = w_down.shape[1]
    out_features = w_up.shape[1]
    assert w_down.shape[0] == in_features and w_up.shape[0] == rank
    scale = float(network_alpha) / float(rank) if network_alpha is not None else 1.0

    # Zero-pad the rank to a lane-dense multiple of 128 (mathematically a no-op:
    # extra W_down columns / W_up rows are zero); both MXU matmuls run lane-dense.
    r_pad = _round_up(rank, 128)
    if r_pad != rank:
        w_down = jnp.pad(w_down, ((0, 0), (0, r_pad - rank)))
        w_up = jnp.pad(w_up, ((0, r_pad - rank), (0, 0)))

    # Flatten leading dims into rows; tile only the row dimension (HBM-bound op).
    x2 = x.reshape(-1, in_features)
    M = x2.shape[0]

    x_bytes = jnp.dtype(orig_dtype).itemsize
    w_bytes = jnp.dtype(w_down.dtype).itemsize
    sublane = _SUBLANE_BY_ITEMSIZE.get(x_bytes, 8)

    # ---- Row-tile selection from a VMEM budget (generation + dtype aware) ----
    vmem_cap = _vmem_capacity_bytes()
    budget = int(vmem_cap * 0.55)                              # leave headroom
    weights_vmem = 2 * (in_features * r_pad + r_pad * out_features) * w_bytes
    per_row = 2 * (in_features + out_features) * x_bytes       # x + out, double-buffered
    cap_rows = 1024 if x_bytes <= 2 else 512                   # bf16 can go bigger
    if block_rows is None:
        block_rows = cap_rows
    tm_budget = max(sublane, (budget - weights_vmem) // max(per_row, 1))
    TM = min(block_rows, tm_budget, max(M, sublane))
    TM = max(sublane, (TM // sublane) * sublane)               # sublane-aligned, round down
    # Keep >= 2 grid steps when M allows it (v7x 2-TC balance + pipeline overlap).
    if pl.cdiv(M, TM) < 2 and M > sublane:
        TM = max(sublane, _round_up(pl.cdiv(M, 2), sublane))

    # No pad/slice for ragged M: Pallas masks the partial last block.
    working = weights_vmem + 2 * TM * (in_features + out_features) * x_bytes
    vmem_limit = min(vmem_cap, max(32 << 20, int(working * 1.3) + (2 << 20)))

    cost = pl.CostEstimate(
        flops=2 * M * in_features * r_pad + 2 * M * r_pad * out_features,
        transcendentals=0,
        bytes_accessed=(M * (in_features + out_features) * x_bytes
                        + (in_features * r_pad + r_pad * out_features) * w_bytes),
    )

    common = dict(M=M, TM=TM, in_features=in_features, r_pad=r_pad,
                  out_features=out_features, out_dtype=orig_dtype, scale=scale,
                  vmem_limit=vmem_limit, cost=cost)
    try:
        # Single-buffer the resident weights to reclaim VMEM headroom.
        out = jax.block_until_ready(
            _build_call(single_buffer_weights=True, **common)(x2, w_down, w_up))
    except Exception:
        # pipeline_mode=pl.Buffered(1) not supported here -> default buffering.
        out = _build_call(single_buffer_weights=False, **common)(x2, w_down, w_up)

    return out.reshape(*lead, out_features)


def reference_forward(x, w_down, w_up, network_alpha=None):
    """Plain-JAX reference mirroring the PyTorch module (scale on the up output)."""
    rank = w_down.shape[1]
    orig_dtype = x.dtype
    h = x.astype(w_down.dtype) @ w_down
    y = h @ w_up
    if network_alpha is not None:
        y = y * (network_alpha / rank)
    return y.astype(orig_dtype)


if __name__ == "__main__":
    key = jax.random.PRNGKey(0)
    key1, key2 = jax.random.split(key)

    def make_case(k, B, L, in_f, out_f, rank, dtype, wdtype):
        kx, kd, ku = jax.random.split(k, 3)
        x = jax.random.normal(kx, (B, L, in_f), jnp.float32).astype(dtype)
        # torch init: down ~ N(0, 1/rank); up is zero in a fresh LoRA, use a small
        # nonzero synthetic up weight so the numerical check is meaningful.
        w_down = (jax.random.normal(kd, (in_f, rank), jnp.float32) / rank).astype(wdtype)
        w_up = (jax.random.normal(ku, (rank, out_f), jnp.float32) * 0.02).astype(wdtype)
        return x, w_down, w_up

    # Case 1: f32, M = 22 rows with TM = 16 -> grid=(2,), ragged (masked) last block.
    x, wd, wu = make_case(key1, 2, 11, 32, 48, 4, jnp.float32, jnp.float32)
    out = jax.block_until_ready(
        lora_linear_forward(x, wd, wu, network_alpha=8.0, block_rows=16))
    ref = reference_forward(x, wd, wu, network_alpha=8.0)
    assert out.shape == ref.shape and out.dtype == x.dtype
    assert jnp.allclose(out, ref, atol=1e-4, rtol=1e-4)

    # Case 2: bf16 activations + bf16 weights (the real Flux LoRA dtype), ragged M.
    # Loose tolerance: per the torch module, the down output is cast to the weight
    # dtype before the up matmul, and the kernel folds alpha/rank in before that cast.
    x, wd, wu = make_case(key2, 2, 9, 64, 32, 8, jnp.bfloat16, jnp.bfloat16)
    out = jax.block_until_ready(
        lora_linear_forward(x, wd, wu, network_alpha=16.0))
    ref = reference_forward(x, wd, wu, network_alpha=16.0)
    assert out.shape == ref.shape and out.dtype == x.dtype
    assert jnp.allclose(out.astype(jnp.float32), ref.astype(jnp.float32),
                        atol=3e-2, rtol=3e-2)

    print("KERNEL_OK")
</pallas_src>

<mosaic_0001>
module attributes {stable_mosaic.version = 11 : i64} {
  func.func @_lora_kernel(%arg0: i32, %arg1: memref<16x32xf32, #tpu.memory_space<vmem>>, %arg2: memref<32x128xf32, #tpu.memory_space<vmem>>, %arg3: memref<128x48xf32, #tpu.memory_space<vmem>>, %arg4: memref<16x48xf32, #tpu.memory_space<vmem>>) attributes {dimension_semantics = [#tpu.dimension_semantics<parallel>], iteration_bounds = array<i64: 2>, scalar_prefetch = 0 : i64, scratch_operands = 0 : i64, tpu.core_type = #tpu.core_type<tc>, window_params = [{transform_indices = @transform_0, window_bounds = array<i64: 16, 32>}, {pipeline_mode = #tpu.pipeline_mode<synchronous>, transform_indices = @transform_1, window_bounds = array<i64: 32, 128>}, {pipeline_mode = #tpu.pipeline_mode<synchronous>, transform_indices = @transform_2, window_bounds = array<i64: 128, 48>}, {transform_indices = @transform_3, window_bounds = array<i64: 16, 48>}]} {
    %c0 = arith.constant 0 : index
    %c0_0 = arith.constant 0 : index
    %0 = vector.load %arg1[%c0, %c0_0] : memref<16x32xf32, #tpu.memory_space<vmem>>, vector<16x32xf32>
    %c0_1 = arith.constant 0 : index
    %c0_2 = arith.constant 0 : index
    %1 = vector.load %arg2[%c0_1, %c0_2] : memref<32x128xf32, #tpu.memory_space<vmem>>, vector<32x128xf32>
    %cst = arith.constant dense<0.000000e+00> : vector<16x128xf32>
    %2 = tpu.matmul %0, %1, %cst {dimension_numbers = #tpu.dot_dimension_numbers<[1], [0], [0], [1], [0, 0, 1, 1], [], []>} : vector<16x32xf32>, vector<32x128xf32>, vector<16x128xf32> -> vector<16x128xf32>
    %cst_3 = arith.constant 2.000000e+00 : f32
    %3 = vector.broadcast %cst_3 : f32 to vector<16x128xf32>
    %4 = arith.mulf %2, %3 : vector<16x128xf32>
    %c0_4 = arith.constant 0 : index
    %c0_5 = arith.constant 0 : index
    %5 = vector.load %arg3[%c0_4, %c0_5] : memref<128x48xf32, #tpu.memory_space<vmem>>, vector<128x48xf32>
    %cst_6 = arith.constant dense<0.000000e+00> : vector<16x48xf32>
    %6 = tpu.matmul %4, %5, %cst_6 {dimension_numbers = #tpu.dot_dimension_numbers<[1], [0], [0], [1], [0, 0, 1, 1], [], []>} : vector<16x128xf32>, vector<128x48xf32>, vector<16x48xf32> -> vector<16x48xf32>
    %c0_7 = arith.constant 0 : index
    %c0_8 = arith.constant 0 : index
    %7 = vector.load %arg4[%c0_7, %c0_8] : memref<16x48xf32, #tpu.memory_space<vmem>>, vector<16x48xf32>
    tpu.vector_store %arg4[%c0_7, %c0_8], %6 {strides = array<i32>} : memref<16x48xf32, #tpu.memory_space<vmem>>, vector<16x48xf32>,
    return
  }
  func.func @transform_0(%arg0: i32) -> (i32, i32) {
    %c0_i32 = arith.constant 0 : i32
    %c0_i32_0 = arith.constant 0 : i32
    return %arg0, %c0_i32 : i32, i32
  }
  func.func @transform_1(%arg0: i32) -> (i32, i32) {
    %c0_i32 = arith.constant 0 : i32
    %c0_i32_0 = arith.constant 0 : i32
    %c0_i32_1 = arith.constant 0 : i32
    return %c0_i32, %c0_i32_0 : i32, i32
  }
  func.func @transform_2(%arg0: i32) -> (i32, i32) {
    %c0_i32 = arith.constant 0 : i32
    %c0_i32_0 = arith.constant 0 : i32
    %c0_i32_1 = arith.constant 0 : i32
    return %c0_i32, %c0_i32_0 : i32, i32
  }
  func.func @transform_3(%arg0: i32) -> (i32, i32) {
    %c0_i32 = arith.constant 0 : i32
    %c0_i32_0 = arith.constant 0 : i32
    return %arg0, %c0_i32 : i32, i32
  }
}

module attributes {stable_mosaic.version = 11 : i64} {
  func.func @_lora_kernel(%arg0: i32, %arg1: memref<16x32xf32, #tpu.memory_space<vmem>>, %arg2: memref<32x128xf32, #tpu.memory_space<vmem>>, %arg3: memref<128x48xf32, #tpu.memory_space<vmem>>, %arg4: memref<16x48xf32, #tpu.memory_space<vmem>>) attributes {dimension_semantics = [#tpu.dimension_semantics<parallel>], iteration_bounds = array<i64: 2>, scalar_prefetch = 0 : i64, scratch_operands = 0 : i64, tpu.core_type = #tpu.core_type<tc>, window_params = [{transform_indices = @transform_0, window_bounds = array<i64: 16, 32>}, {pipeline_mode = #tpu.pipeline_mode<synchronous>, transform_indices = @transform_1, window_bounds = array<i64: 32, 128>}, {pipeline_mode = #tpu.pipeline_mode<synchronous>, transform_indices = @transform_2, window_bounds = array<i64: 128, 48>}, {transform_indices = @transform_3, window_bounds = array<i64: 16, 48>}]} {
    %c0 = arith.constant 0 : index
    %c0_0 = arith.constant 0 : index
    %0 = vector.load %arg1[%c0, %c0_0] : memref<16x32xf32, #tpu.memory_space<vmem>>, vector<16x32xf32>
    %c0_1 = arith.constant 0 : index
    %c0_2 = arith.constant 0 : index
    %1 = vector.load %arg2[%c0_1, %c0_2] : memref<32x128xf32, #tpu.memory_space<vmem>>, vector<32x128xf32>
    %cst = arith.constant dense<0.000000e+00> : vector<16x128xf32>
    %2 = tpu.matmul %0, %1, %cst {dimension_numbers = #tpu.dot_dimension_numbers<[1], [0], [0], [1], [0, 0, 1, 1], [], []>} : vector<16x32xf32>, vector<32x128xf32>, vector<16x128xf32> -> vector<16x128xf32>
    %cst_3 = arith.constant 2.000000e+00 : f32
    %3 = vector.broadcast %cst_3 : f32 to vector<16x128xf32>
    %4 = arith.mulf %2, %3 : vector<16x128xf32>
    %c0_4 = arith.constant 0 : index
    %c0_5 = arith.constant 0 : index
    %5 = vector.load %arg3[%c0_4, %c0_5] : memref<128x48xf32, #tpu.memory_space<vmem>>, vector<128x48xf32>
    %cst_6 = arith.constant dense<0.000000e+00> : vector<16x48xf32>
    %6 = tpu.matmul %4, %5, %cst_6 {dimension_numbers = #tpu.dot_dimension_numbers<[1], [0], [0], [1], [0, 0, 1, 1], [], []>} : vector<16x128xf32>, vector<128x48xf32>, vector<16x48xf32> -> vector<16x48xf32>
    %c0_7 = arith.constant 0 : index
    %c0_8 = arith.constant 0 : index
    %7 = vector.load %arg4[%c0_7, %c0_8] : memref<16x48xf32, #tpu.memory_space<vmem>>, vector<16x48xf32>
    tpu.vector_store %arg4[%c0_7, %c0_8], %6 {strides = array<i32>} : memref<16x48xf32, #tpu.memory_space<vmem>>, vector<16x48xf32>,
    return
  }
  func.func @transform_0(%arg0: i32) -> (i32, i32) {
    %c0_i32 = arith.constant 0 : i32
    %c0_i32_0 = arith.constant 0 : i32
    return %arg0, %c0_i32 : i32, i32
  }
  func.func @transform_1(%arg0: i32) -> (i32, i32) {
    %c0_i32 = arith.constant 0 : i32
    %c0_i32_0 = arith.constant 0 : i32
    %c0_i32_1 = arith.constant 0 : i32
    return %c0_i32, %c0_i32_0 : i32, i32
  }
  func.func @transform_2(%arg0: i32) -> (i32, i32) {
    %c0_i32 = arith.constant 0 : i32
    %c0_i32_0 = arith.constant 0 : i32
    %c0_i32_1 = arith.constant 0 : i32
    return %c0_i32, %c0_i32_0 : i32, i32
  }
  func.func @transform_3(%arg0: i32) -> (i32, i32) {
    %c0_i32 = arith.constant 0 : i32
    %c0_i32_0 = arith.constant 0 : i32
    return %arg0, %c0_i32 : i32, i32
  }
}

</mosaic_0001>

<bundles_post_ra>
// kernel: tpu_custom_call.1
= control target key start
LH: loop header
LB: loop body
LE: loop exit
PB: predicated region body
PF: predicated region fallthrough
CT: control target
= control target key end

     0   :  { %8 = vsyncpa [#allocation3], 0  ;;  %s895_s0 = inlined_call_operand.vmem [shape: f32[22,32], index: 0, kind: input, shape index: {}]   ;;  %s896_s1 = inlined_call_operand.vmem [shape: f32[32,128], index: 1, kind: input, shape index: {}]   ;;  %s897_s2 = inlined_call_operand.vmem [shape: f32[128,48], index: 2, kind: input, shape index: {}]   ;;  %s898_s3 = inlined_call_operand.hbm [shape: f32[22,48], index: 3, kind: output, shape index: {}]  }
   0x1   :  { %10 = vsyncpa [#allocation3 + $0x1], 0  ;;  %s718_s12 = smov 0   ;;  %s720_s13 = smov 0  }
   0x2   :  { %s722_s14 = smov 0   ;;  %s724_s15 = smov 0  }
   0x3 LB: > { %s739_s16 = sadd.s32 4294967295, %s693_s15   ;;  %s462_s17 = sadd.s32 4294967294, %s693_s15   ;;  %s693_s15 = sphi %s724_s15, %s904_s15   ;;  %s689_s14 = sphi %s722_s14, %s903_s14   ;;  %s685_s13 = sphi %s720_s13, %s902_s13   ;;  %s681_s12 = sphi %s718_s12, %s901_s12  }
   0x4   : > { %s743_s18 = sadd.s32 1, %s693_s15   ;;  %s91_s19 = sadd.s32 1, %s689_s14 }
   0x5   : > { %s88_s20 = ssub.s32 %s693_s15, %s743_s18  ;;  %p101_p0 = scmp.ne.s32.totalorder %s689_s14, %s685_s13 }
   0x6   : > { %p89_p1 = scmp.eq.s32.totalorder %s88_s20, 0  ;;  %p102_p2 = scmp.eq.s32.totalorder %s739_s16, 1 }
   0x7   : > { %p107_p3 = scmp.ne.s32.totalorder %s685_s13, %s681_s12  ;;  %p108_p4 = scmp.eq.s32.totalorder %s462_s17, 1 }
   0x8   : > { %s754_s21 = scalar_select %p89_p1, %s689_s14, %s91_s19  }
   0x9   : > { %p756_p5 = por %p102_p2, %p101_p0  ;;  %p760_p6 = por %p108_p4, %p107_p3 }
   0xa   : > { %p465_p7 = scmp.ge.s32.totalorder %s693_s15, 1  ;;  %p149_p8 = scmp.lt.s32.totalorder %s693_s15, 3 }
   0xc   : > { %p150_p9 = pnand %p465_p7, %p149_p8 }
   0xd   : > { %v198_v0 = vld [vmem:[%s896_s1] sm:$0xff] (!%p150_p9)  ;;  %v199_v1 = vld [vmem:[%s896_s1 + $0x8] sm:$0xff] (!%p150_p9)  ;;  %v200_v2 = vld [vmem:[%s896_s1 + $0x10] sm:$0xff] (!%p150_p9)  ;;  %s776_s30 = sshll.u32 (!%p150_p9), %s739_s16, 1  ;;  %vm202_vm0 = vcmask (!%p150_p9), 261120   ;;  %s174_s9 = sand.u32 (!%p150_p9), 1, %s685_s13  }
   0xe   : > { %153 = sbr.rel (%p150_p9) target bundleno = 485 (0x1e5), region = 32  ;;  %v551_v3 = vpack.c.bf16 (!%p150_p9), %v199_v1, %v198_v0  ;;  %v201_v4 = vld [vmem:[%s896_s1 + $0x18] sm:$0xff] (!%p150_p9)  ;;  %p182_p10 = scmp.lt.s32.totalorder (!%p150_p9), %s776_s30, 2  ;;  %v286_v5 = vld [vmem:[%s897_s2] sm:$0xff] (!%p150_p9)  ;;  %v287_v6 = vld [vmem:[%s897_s2 + $0x8] sm:$0xff] (!%p150_p9)  ;;  %vm377_vm1 = vcmask (!%p150_p9), 392192  }
   0xf   : > { %v555_v7 = vpack.c.bf16 (!%p150_p9), %v201_v4, %v200_v2  ;;  %v559_v8 = vpack.c.bf16 (!%p150_p9), %v287_v6, %v286_v5  ;;  %v288_v9 = vld [vmem:[%s897_s2 + $0x10] sm:$0xff] (!%p150_p9)  ;;  %v289_v10 = vld [vmem:[%s897_s2 + $0x18] sm:$0xff] (!%p150_p9)  ;;  %v290_v12 = vld [vmem:[%s897_s2 + $0x20] sm:$0xff] (!%p150_p9)  ;;  %s466_s10 = sshll.u32 (!%p150_p9), %s174_s9, 4  ;;  %s835_s17 = scalar_lea.sflag (!%p150_p9), [#allocation3], %s174_s9 }
  0x10   : > { %552 = vmatprep.subr.bf16.mxu0 (!%p150_p9), %v551_v3  ;;  %v563_v11 = vpack.c.bf16 (!%p150_p9), %v289_v10, %v288_v9  ;;  %v291_v13 = vld [vmem:[%s897_s2 + $0x28] sm:$0xff] (!%p150_p9)  ;;  %v292_v16 = vld [vmem:[%s897_s2 + $0x30] sm:$0xff] (!%p150_p9)  ;;  %v293_v17 = vld [vmem:[%s897_s2 + $0x38] sm:$0xff] (!%p150_p9)  ;;  %s176_s11 = scalar_lea.vmem (!%p150_p9), [#allocation2], %s466_s10 }
  0x11   : > { %554 = vmatpush3.bf16.msra.mxu0 (!%p150_p9), %v551_v3  ;;  %560 = vmatprep.subr.bf16.mxu1 (!%p150_p9), %v559_v8  ;;  %v567_v14 = vpack.c.bf16 (!%p150_p9), %v291_v13, %v290_v12  ;;  %v571_v19 = vpack.c.bf16 (!%p150_p9), %v293_v17, %v292_v16  ;;  %v294_v20 = vld [vmem:[%s897_s2 + $0x40] sm:$0xff] (!%p150_p9)  ;;  %v295_v21 = vld [vmem:[%s897_s2 + $0x48] sm:$0xff] (!%p150_p9)  ;;  %v296_v23 = vld [vmem:[%s897_s2 + $0x50] sm:$0xff] (!%p150_p9) }
  0x12   : > { %556 = vmatprep.subr.bf16.mxu0 (!%p150_p9), %v555_v7  ;;  %562 = vmatpush3.bf16.msra.mxu1 (!%p150_p9), %v559_v8  ;;  %v575_v22 = vpack.c.bf16 (!%p150_p9), %v295_v21, %v294_v20  ;;  %v297_v24 = vld [vmem:[%s897_s2 + $0x58] sm:$0xff] (!%p150_p9)  ;;  %v298_v26 = vld [vmem:[%s897_s2 + $0x60] sm:$0xff] (!%p150_p9)  ;;  %v299_v27 = vld [vmem:[%s897_s2 + $0x68] sm:$0xff] (!%p150_p9) }
  0x13   : > { %564 = vmatprep.subr.bf16.mxu1 (!%p150_p9), %v563_v11  ;;  %v579_v25 = vpack.c.bf16 (!%p150_p9), %v297_v24, %v296_v23  ;;  %v583_v28 = vpack.c.bf16 (!%p150_p9), %v299_v27, %v298_v26  ;;  %v300_v29 = vld [vmem:[%s897_s2 + $0x70] sm:$0xff] (!%p150_p9)  ;;  %v301_v30 = vld [vmem:[%s897_s2 + $0x78] sm:$0xff] (!%p150_p9) }
  0x14   : > { %v587_v31 = vpack.c.bf16 (!%p150_p9), %v301_v30, %v300_v29 }
  0x15   : > { %s183_s20 = scalar_select %p182_p10, %s776_s30, 2  ;;  %558 = vmatpush3.bf16.msra.mxu0 %v555_v7 }
  0x16   : > { %566 = vmatpush3.bf16.msra.mxu1 %v563_v11  ;;  %s389_s19 = ssub.s32 (%p756_p5), 3, %s776_s30 }
  0x17   : > { %s468_s28 = sshll.u32 %s183_s20, 3  ;;  %568 = vmatprep.subr.bf16.mxu1 %v567_v14  ;;  %p390_p11 = scmp.lt.s32.totalorder (%p756_p5), %s389_s19, 2 }
  0x18   : > { %s185_s5 = scalar_lea.vmem %s895_s0, %s468_s28 }
  0x19   : > { %v196_v15 = vld [vmem:[%s185_s5] sm:$0xff]  ;;  %v197_v18 = vld [vmem:[%s185_s5 + $0x8] sm:$0xff] }
  0x1a   : > { %513 = vmatprep.mubr.msk.f32.mxu0 %vm202_vm0, %v196_v15  ;;  %570 = vmatpush3.bf16.msra.mxu1 %v567_v14 }
  0x1b   : > { %514 = vmatmul.mubr.msk.f32.vlgmr.msra.gmra.mrb[0].mxu0 %vm202_vm0, %v197_v18  ;;  %572 = vmatprep.subr.bf16.mxu1 %v571_v19 }
  0x1e   : > { %574 = vmatpush3.bf16.msra.mxu1 %v571_v19 }
  0x1f   : > { %576 = vmatprep.subr.bf16.mxu1 %v575_v22 }
  0x22   : > { %578 = vmatpush3.bf16.msra.mxu1 %v575_v22 }
  0x23   : > { %580 = vmatprep.subr.bf16.mxu1 %v579_v25 }
  0x26   : > { %582 = vmatpush3.bf16.msra.mxu1 %v579_v25 }
  0x27   : > { %584 = vmatprep.subr.bf16.mxu1 %v583_v28 }
  0x2a   : > { %586 = vmatpush3.bf16.msra.mxu1 %v583_v28 }
  0x2b   : > { %588 = vmatprep.subr.bf16.mxu1 %v587_v31 }
  0x2e   : > { %590 = vmatpush3.bf16.msra.mxu1 %v587_v31 }
  0xee   : > { %v515_v32 = vpop.f32.mrb[0].mxu0 }
  0xef   : > { %v275_v33 = vpop.f32.mrb[1].mxu0  ;;  %v285_v35 = vmul.f32 2.0, %v515_v32 }
  0xf0   : > { %v284_v34 = vmul.f32 2.0, %v275_v33 }
  0xf2   : > { %548 = vmatprep.mubr.f32.mxu1 %v284_v34 }
  0xf3   : > { %549 = vmatmul.mubr.f32.vlgmr.msra.gmra.mrb[0].mxu1 %v285_v35 }
 0x1c2   : > { %387 = sbr.rel (!%p756_p5) target bundleno = 485 (0x1e5), region = 36 }
 0x1c6   : > { %v550_v36 = vpop.f32.mrb[0].mxu1 }
 0x1c7   : > { %379 = vst.msk [vmem:[%s176_s11 + $0x8] sm:$0xff] %vm377_vm1, %v550_v36  ;;  %v368_v37 = vpop.f32.mrb[1].mxu1 }
 0x1c8   : > { %378 = vst.msk [vmem:[%s176_s11] sm:$0xff] %vm377_vm1, %v368_v37 }
 0x1c9   : > { %s906_s19 = smov (!%p390_p11, %s389_s19), 2 }
 0x1ca   : > { %s840_s20 = sshll.u32 %s906_s19, 7 }
 0x1cb   : > { %s394_s24 = ssub.s32 256, %s840_s20 }
 0x1cc   : > { %395 = vsyncadd %s835_s17, %s394_s24  ;;  %p474_p12 = scmp.ne.s32.totalorder %s840_s20, 0  ;;  %s480_s25 = sshll.u32 %s739_s16, 8 }
 0x1cd   : > { %s849_s22 = scalar_lea.hbm %s898_s3, %s480_s25  ;;  %s400_s28 = sshll.u32 %s176_s11, 4  ;;  %s851_s28 = int_to_ptr.vmem [resolvable:$true] %s400_s28 }
 0x1ce   : > { %s631_s30 = scalar_lea.vmem %s851_s28, %s840_s20  ;;  %s695_s29 = smov [#allocation2]  }
 0x1cf   : > { %p632_p13 = scmp.ne.s32.totalorder %s851_s28, %s631_s30  ;;  %s635_s4 = sshll.u32 %s695_s29, 4  ;;  %s636_s4 = int_to_ptr.vmem [resolvable:$false] %s635_s4 }
 0x1d0   : > { %s637_s16 = scalar_lea.vmem %s636_s4, 512  ;;  %p638_p2 = scmp.lt.s32.totalorder %s851_s28, %s636_s4 }
 0x1d1   : > { %p633_p0 = pnand %p632_p13, %p474_p12  ;;  %p639_p3 = scmp.lt.s32.totalorder %s637_s16, %s631_s30 }
 0x1d3   : > { %p634_p1 = pneg %p633_p0  ;;  %p640_p4 = por %p639_p3, %p638_p2 }
 0x1d5   : > { %p641_p5 = pnand %p640_p4, %p634_p1 }
 0x1d7   : > { %644 = shalt.err (!%p641_p5)
}
 0x1d8   : > { %s645_s5 = scalar_lea.hbm %s849_s22, %s840_s20  ;;  %s649_s8 = scalar_lea.hbm %s898_s3, 384 }
 0x1d9   : > { %p646_p7 = scmp.ne.s32.totalorder %s849_s22, %s645_s5  ;;  %p650_p10 = scmp.lt.u32.totalorder %s849_s22, %s898_s3 }
 0x1da   : > { %p651_p11 = scmp.lt.u32.totalorder %s649_s8, %s645_s5  ;;  %p653_p0 = scmp.lt.u32.totalorder %s645_s5, %s849_s22 }
 0x1db   : > { %p647_p8 = pnand %p646_p7, %p474_p12 }
 0x1dc   : > { %p652_p13 = por %p651_p11, %p650_p10 }
 0x1dd   : > { %p648_p9 = pneg %p647_p8 }
 0x1de   : > { %p654_p1 = por %p653_p0, %p652_p13 }
 0x1e0   : > { %p655_p2 = pnand %p654_p1, %p648_p9 }
 0x1e2   : > { %658 = shalt.err (!%p655_p2)
}
 0x1e3   : > { %s696_s11 = smov 128   ;;  %s697_s19 = smov 8  }
 0x1e4   : > { %406 = dma.vmem_to_hbm [thread:$0]  (%p474_p12), %s851_s28, %s840_s20, %s849_s22, %s835_s17, %s696_s11, %s696_s11, %s697_s19  }
 0x1e5 PF: > { %p596_p3 = scmp.ge.s32.totalorder %s693_s15, 2  ;;  %s415_s24 = sand.u32 1, %s681_s12  }
 0x1e6   : > { %s416_s25 = scalar_lea.sflag [#allocation3], %s415_s24 }
 0x1e7   : > { %p593_p4 = pnand %p596_p3, %p760_p6 }
 0x1e9   : > { %676 = dma.done.wait (!%p593_p4), %s416_s25, 256  }
 0x1ea   : > { %678 = vsyncadd (!%p593_p4), %s416_s25, 4294967040  ;;  %p13_p5 = scmp.ge.s32.totalorder %s743_s18, 4   ;;  %s901_s12 = smov %s685_s13 }
 0x1eb   : > { %s902_s13 = smov %s689_s14  ;;  %s903_s14 = smov %s754_s21 }
 0x1ec   : > { %s904_s15 = smov %s743_s18  ;;  %15 = sbr.rel (!%p13_p5) target bundleno = 3 (0x3), region = 67 }
 0x1f3   :  { %421 = vsyncpa [#allocation3], 1 }
 0x1f4   :  { %423 = vsyncpa [#allocation3 + $0x1], 1 }

// kernel: tpu_custom_call.1
= control target key start
LH: loop header
LB: loop body
LE: loop exit
PB: predicated region body
PF: predicated region fallthrough
CT: control target
= control target key end

     0   :  { %8 = vsyncpa [#allocation3], 0  ;;  %s895_s0 = inlined_call_operand.vmem [shape: f32[22,32], index: 0, kind: input, shape index: {}]   ;;  %s896_s1 = inlined_call_operand.vmem [shape: f32[32,128], index: 1, kind: input, shape index: {}]   ;;  %s897_s2 = inlined_call_operand.vmem [shape: f32[128,48], index: 2, kind: input, shape index: {}]   ;;  %s898_s3 = inlined_call_operand.hbm [shape: f32[22,48], index: 3, kind: output, shape index: {}]  }
   0x1   :  { %10 = vsyncpa [#allocation3 + $0x1], 0  ;;  %s718_s12 = smov 0   ;;  %s720_s13 = smov 0  }
   0x2   :  { %s722_s14 = smov 0   ;;  %s724_s15 = smov 0  }
   0x3 LB: > { %s739_s16 = sadd.s32 4294967295, %s693_s15   ;;  %s462_s17 = sadd.s32 4294967294, %s693_s15   ;;  %s693_s15 = sphi %s724_s15, %s904_s15   ;;  %s689_s14 = sphi %s722_s14, %s903_s14   ;;  %s685_s13 = sphi %s720_s13, %s902_s13   ;;  %s681_s12 = sphi %s718_s12, %s901_s12  }
   0x4   : > { %s743_s18 = sadd.s32 1, %s693_s15   ;;  %s91_s19 = sadd.s32 1, %s689_s14 }
   0x5   : > { %s88_s20 = ssub.s32 %s693_s15, %s743_s18  ;;  %p101_p0 = scmp.ne.s32.totalorder %s689_s14, %s685_s13 }
   0x6   : > { %p89_p1 = scmp.eq.s32.totalorder %s88_s20, 0  ;;  %p102_p2 = scmp.eq.s32.totalorder %s739_s16, 1 }
   0x7   : > { %p107_p3 = scmp.ne.s32.totalorder %s685_s13, %s681_s12  ;;  %p108_p4 = scmp.eq.s32.totalorder %s462_s17, 1 }
   0x8   : > { %s754_s21 = scalar_select %p89_p1, %s689_s14, %s91_s19  }
   0x9   : > { %p756_p5 = por %p102_p2, %p101_p0  ;;  %p760_p6 = por %p108_p4, %p107_p3 }
   0xa   : > { %p465_p7 = scmp.ge.s32.totalorder %s693_s15, 1  ;;  %p149_p8 = scmp.lt.s32.totalorder %s693_s15, 3 }
   0xc   : > { %p150_p9 = pnand %p465_p7, %p149_p8 }
   0xd   : > { %v198_v0 = vld [vmem:[%s896_s1] sm:$0xff] (!%p150_p9)  ;;  %v199_v1 = vld [vmem:[%s896_s1 + $0x8] sm:$0xff] (!%p150_p9)  ;;  %v200_v2 = vld [vmem:[%s896_s1 + $0x10] sm:$0xff] (!%p150_p9)  ;;  %s776_s30 = sshll.u32 (!%p150_p9), %s739_s16, 1  ;;  %vm202_vm0 = vcmask (!%p150_p9), 261120   ;;  %s174_s9 = sand.u32 (!%p150_p9), 1, %s685_s13  }
   0xe   : > { %153 = sbr.rel (%p150_p9) target bundleno = 485 (0x1e5), region = 32  ;;  %v551_v3 = vpack.c.bf16 (!%p150_p9), %v199_v1, %v198_v0  ;;  %v201_v4 = vld [vmem:[%s896_s1 + $0x18] sm:$0xff] (!%p150_p9)  ;;  %p182_p10 = scmp.lt.s32.totalorder (!%p150_p9), %s776_s30, 2  ;;  %v286_v5 = vld [vmem:[%s897_s2] sm:$0xff] (!%p150_p9)  ;;  %v287_v6 = vld [vmem:[%s897_s2 + $0x8] sm:$0xff] (!%p150_p9)  ;;  %vm377_vm1 = vcmask (!%p150_p9), 392192  }
   0xf   : > { %v555_v7 = vpack.c.bf16 (!%p150_p9), %v201_v4, %v200_v2  ;;  %v559_v8 = vpack.c.bf16 (!%p150_p9), %v287_v6, %v286_v5  ;;  %v288_v9 = vld [vmem:[%s897_s2 + $0x10] sm:$0xff] (!%p150_p9)  ;;  %v289_v10 = vld [vmem:[%s897_s2 + $0x18] sm:$0xff] (!%p150_p9)  ;;  %v290_v12 = vld [vmem:[%s897_s2 + $0x20] sm:$0xff] (!%p150_p9)  ;;  %s466_s10 = sshll.u32 (!%p150_p9), %s174_s9, 4  ;;  %s835_s17 = scalar_lea.sflag (!%p150_p9), [#allocation3], %s174_s9 }
  0x10   : > { %552 = vmatprep.subr.bf16.mxu0 (!%p150_p9), %v551_v3  ;;  %v563_v11 = vpack.c.bf16 (!%p150_p9), %v289_v10, %v288_v9  ;;  %v291_v13 = vld [vmem:[%s897_s2 + $0x28] sm:$0xff] (!%p150_p9)  ;;  %v292_v16 = vld [vmem:[%s897_s2 + $0x30] sm:$0xff] (!%p150_p9)  ;;  %v293_v17 = vld [vmem:[%s897_s2 + $0x38] sm:$0xff] (!%p150_p9)  ;;  %s176_s11 = scalar_lea.vmem (!%p150_p9), [#allocation2], %s466_s10 }
  0x11   : > { %554 = vmatpush3.bf16.msra.mxu0 (!%p150_p9), %v551_v3  ;;  %560 = vmatprep.subr.bf16.mxu1 (!%p150_p9), %v559_v8  ;;  %v567_v14 = vpack.c.bf16 (!%p150_p9), %v291_v13, %v290_v12  ;;  %v571_v19 = vpack.c.bf16 (!%p150_p9), %v293_v17, %v292_v16  ;;  %v294_v20 = vld [vmem:[%s897_s2 + $0x40] sm:$0xff] (!%p150_p9)  ;;  %v295_v21 = vld [vmem:[%s897_s2 + $0x48] sm:$0xff] (!%p150_p9)  ;;  %v296_v23 = vld [vmem:[%s897_s2 + $0x50] sm:$0xff] (!%p150_p9) }
  0x12   : > { %556 = vmatprep.subr.bf16.mxu0 (!%p150_p9), %v555_v7  ;;  %562 = vmatpush3.bf16.msra.mxu1 (!%p150_p9), %v559_v8  ;;  %v575_v22 = vpack.c.bf16 (!%p150_p9), %v295_v21, %v294_v20  ;;  %v297_v24 = vld [vmem:[%s897_s2 + $0x58] sm:$0xff] (!%p150_p9)  ;;  %v298_v26 = vld [vmem:[%s897_s2 + $0x60] sm:$0xff] (!%p150_p9)  ;;  %v299_v27 = vld [vmem:[%s897_s2 + $0x68] sm:$0xff] (!%p150_p9) }
  0x13   : > { %564 = vmatprep.subr.bf16.mxu1 (!%p150_p9), %v563_v11  ;;  %v579_v25 = vpack.c.bf16 (!%p150_p9), %v297_v24, %v296_v23  ;;  %v583_v28 = vpack.c.bf16 (!%p150_p9), %v299_v27, %v298_v26  ;;  %v300_v29 = vld [vmem:[%s897_s2 + $0x70] sm:$0xff] (!%p150_p9)  ;;  %v301_v30 = vld [vmem:[%s897_s2 + $0x78] sm:$0xff] (!%p150_p9) }
  0x14   : > { %v587_v31 = vpack.c.bf16 (!%p150_p9), %v301_v30, %v300_v29 }
  0x15   : > { %s183_s20 = scalar_select %p182_p10, %s776_s30, 2  ;;  %558 = vmatpush3.bf16.msra.mxu0 %v555_v7 }
  0x16   : > { %566 = vmatpush3.bf16.msra.mxu1 %v563_v11  ;;  %s389_s19 = ssub.s32 (%p756_p5), 3, %s776_s30 }
  0x17   : > { %s468_s28 = sshll.u32 %s183_s20, 3  ;;  %568 = vmatprep.subr.bf16.mxu1 %v567_v14  ;;  %p390_p11 = scmp.lt.s32.totalorder (%p756_p5), %s389_s19, 2 }
  0x18   : > { %s185_s5 = scalar_lea.vmem %s895_s0, %s468_s28 }
  0x19   : > { %v196_v15 = vld [vmem:[%s185_s5] sm:$0xff]  ;;  %v197_v18 = vld [vmem:[%s185_s5 + $0x8] sm:$0xff] }
  0x1a   : > { %513 = vmatprep.mubr.msk.f32.mxu0 %vm202_vm0, %v196_v15  ;;  %570 = vmatpush3.bf16.msra.mxu1 %v567_v14 }
  0x1b   : > { %514 = vmatmul.mubr.msk.f32.vlgmr.msra.gmra.mrb[0].mxu0 %vm202_vm0, %v197_v18  ;;  %572 = vmatprep.subr.bf16.mxu1 %v571_v19 }
  0x1e   : > { %574 = vmatpush3.bf16.msra.mxu1 %v571_v19 }
  0x1f   : > { %576 = vmatprep.subr.bf16.mxu1 %v575_v22 }
  0x22   : > { %578 = vmatpush3.bf16.msra.mxu1 %v575_v22 }
  0x23   : > { %580 = vmatprep.subr.bf16.mxu1 %v579_v25 }
  0x26   : > { %582 = vmatpush3.bf16.msra.mxu1 %v579_v25 }
  0x27   : > { %584 = vmatprep.subr.bf16.mxu1 %v583_v28 }
  0x2a   : > { %586 = vmatpush3.bf16.msra.mxu1 %v583_v28 }
  0x2b   : > { %588 = vmatprep.subr.bf16.mxu1 %v587_v31 }
  0x2e   : > { %590 = vmatpush3.bf16.msra.mxu1 %v587_v31 }
  0xee   : > { %v515_v32 = vpop.f32.mrb[0].mxu0 }
  0xef   : > { %v275_v33 = vpop.f32.mrb[1].mxu0  ;;  %v285_v35 = vmul.f32 2.0, %v515_v32 }
  0xf0   : > { %v284_v34 = vmul.f32 2.0, %v275_v33 }
  0xf2   : > { %548 = vmatprep.mubr.f32.mxu1 %v284_v34 }
  0xf3   : > { %549 = vmatmul.mubr.f32.vlgmr.msra.gmra.mrb[0].mxu1 %v285_v35 }
 0x1c2   : > { %387 = sbr.rel (!%p756_p5) target bundleno = 485 (0x1e5), region = 36 }
 0x1c6   : > { %v550_v36 = vpop.f32.mrb[0].mxu1 }
 0x1c7   : > { %379 = vst.msk [vmem:[%s176_s11 + $0x8] sm:$0xff] %vm377_vm1, %v550_v36  ;;  %v368_v37 = vpop.f32.mrb[1].mxu1 }
 0x1c8   : > { %378 = vst.msk [vmem:[%s176_s11] sm:$0xff] %vm377_vm1, %v368_v37 }
 0x1c9   : > { %s906_s19 = smov (!%p390_p11, %s389_s19), 2 }
 0x1ca   : > { %s840_s20 = sshll.u32 %s906_s19, 7 }
 0x1cb   : > { %s394_s24 = ssub.s32 256, %s840_s20 }
 0x1cc   : > { %395 = vsyncadd %s835_s17, %s394_s24  ;;  %p474_p12 = scmp.ne.s32.totalorder %s840_s20, 0  ;;  %s480_s25 = sshll.u32 %s739_s16, 8 }
 0x1cd   : > { %s849_s22 = scalar_lea.hbm %s898_s3, %s480_s25  ;;  %s400_s28 = sshll.u32 %s176_s11, 4  ;;  %s851_s28 = int_to_ptr.vmem [resolvable:$true] %s400_s28 }
 0x1ce   : > { %s631_s30 = scalar_lea.vmem %s851_s28, %s840_s20  ;;  %s695_s29 = smov [#allocation2]  }
 0x1cf   : > { %p632_p13 = scmp.ne.s32.totalorder %s851_s28, %s631_s30  ;;  %s635_s4 = sshll.u32 %s695_s29, 4  ;;  %s636_s4 = int_to_ptr.vmem [resolvable:$false] %s635_s4 }
 0x1d0   : > { %s637_s16 = scalar_lea.vmem %s636_s4, 512  ;;  %p638_p2 = scmp.lt.s32.totalorder %s851_s28, %s636_s4 }
 0x1d1   : > { %p633_p0 = pnand %p632_p13, %p474_p12  ;;  %p639_p3 = scmp.lt.s32.totalorder %s637_s16, %s631_s30 }
 0x1d3   : > { %p634_p1 = pneg %p633_p0  ;;  %p640_p4 = por %p639_p3, %p638_p2 }
 0x1d5   : > { %p641_p5 = pnand %p640_p4, %p634_p1 }
 0x1d7   : > { %644 = shalt.err (!%p641_p5)
}
 0x1d8   : > { %s645_s5 = scalar_lea.hbm %s849_s22, %s840_s20  ;;  %s649_s8 = scalar_lea.hbm %s898_s3, 384 }
 0x1d9   : > { %p646_p7 = scmp.ne.s32.totalorder %s849_s22, %s645_s5  ;;  %p650_p10 = scmp.lt.u32.totalorder %s849_s22, %s898_s3 }
 0x1da   : > { %p651_p11 = scmp.lt.u32.totalorder %s649_s8, %s645_s5  ;;  %p653_p0 = scmp.lt.u32.totalorder %s645_s5, %s849_s22 }
 0x1db   : > { %p647_p8 = pnand %p646_p7, %p474_p12 }
 0x1dc   : > { %p652_p13 = por %p651_p11, %p650_p10 }
 0x1dd   : > { %p648_p9 = pneg %p647_p8 }
 0x1de   : > { %p654_p1 = por %p653_p0, %p652_p13 }
 0x1e0   : > { %p655_p2 = pnand %p654_p1, %p648_p9 }
 0x1e2   : > { %658 = shalt.err (!%p655_p2)
}
 0x1e3   : > { %s696_s11 = smov 128   ;;  %s697_s19 = smov 8  }
 0x1e4   : > { %406 = dma.vmem_to_hbm [thread:$0]  (%p474_p12), %s851_s28, %s840_s20, %s849_s22, %s835_s17, %s696_s11, %s696_s11, %s697_s19  }
 0x1e5 PF: > { %p596_p3 = scmp.ge.s32.totalorder %s693_s15, 2  ;;  %s415_s24 = sand.u32 1, %s681_s12  }
 0x1e6   : > { %s416_s25 = scalar_lea.sflag [#allocation3], %s415_s24 }
 0x1e7   : > { %p593_p4 = pnand %p596_p3, %p760_p6 }
 0x1e9   : > { %676 = dma.done.wait (!%p593_p4), %s416_s25, 256  }
 0x1ea   : > { %678 = vsyncadd (!%p593_p4), %s416_s25, 4294967040  ;;  %p13_p5 = scmp.ge.s32.totalorder %s743_s18, 4   ;;  %s901_s12 = smov %s685_s13 }
 0x1eb   : > { %s902_s13 = smov %s689_s14  ;;  %s903_s14 = smov %s754_s21 }
 0x1ec   : > { %s904_s15 = smov %s743_s18  ;;  %15 = sbr.rel (!%p13_p5) target bundleno = 3 (0x3), region = 67 }
 0x1f3   :  { %421 = vsyncpa [#allocation3], 1 }
 0x1f4   :  { %423 = vsyncpa [#allocation3 + $0x1], 1 }

</bundles_post_ra>
